<compile_context>
chip_gen: v6e
topology: v6e:2x2x1
jax: 0.10.0
libtpu: 0.0.40
codegen_flags: <defaults>
</compile_context>

<pallas_src>
import functools

import jax
import jax.numpy as jnp
from jax.experimental import pallas as pl
from jax.experimental.pallas import tpu as pltpu

IN_FEATURES = 784
OUT_FEATURES = 10


def _round_up(x, m):
    return (x + m - 1) // m * m


def mlp_kernel(x_ref, w1_ref, b1_ref, w2_ref, b2_ref, o_ref):
    # Cast x (f32 in HBM) to the weight dtype (bf16) on the VPU -- the VPU has
    # huge slack on this mem-bound kernel; MXU accumulates in f32.
    x = x_ref[...].astype(w1_ref.dtype)
    # fc1: (TB, 784) @ (784, Hp) -> f32 accumulate, f32 bias add.
    h = jnp.dot(x, w1_ref[...], preferred_element_type=jnp.float32)
    h = h + b1_ref[...]
    # IOConstraint(io_bits=0) -> identity.
    # fc2: cast activations back to bf16 for the MXU; padded columns stay 0.
    h = h.astype(w2_ref.dtype)
    out = jnp.dot(h, w2_ref[...], preferred_element_type=jnp.float32)
    out = out + b2_ref[...]
    o_ref[...] = out.astype(o_ref.dtype)


def prepare_params(w1, b1, w2, b2, compute_dtype=jnp.bfloat16):
    """Pad/cast parameters ONCE (outside the per-call jitted path).

    w1: (784, H), b1: (H,) or (1, H), w2: (H, 10), b2: (10,) or (1, 10).
    Returns bf16 weights padded to lane-dense H_pad/N_pad and f32 biases.
    Zero padding keeps the sliced result identical to the unpadded math.
    """
    H = w1.shape[1]
    H_pad = _round_up(H, 128)             # 128 for H=100
    N_pad = _round_up(OUT_FEATURES, 128)  # 128

    w1p = jnp.zeros((IN_FEATURES, H_pad), compute_dtype)
    w1p = w1p.at[:, :H].set(w1.astype(compute_dtype))
    b1p = jnp.zeros((1, H_pad), jnp.float32)
    b1p = b1p.at[:, :H].set(b1.astype(jnp.float32).reshape(1, H))
    w2p = jnp.zeros((H_pad, N_pad), compute_dtype)
    w2p = w2p.at[:H, :OUT_FEATURES].set(w2.astype(compute_dtype))
    b2p = jnp.zeros((1, N_pad), jnp.float32)
    b2p = b2p.at[:, :OUT_FEATURES].set(
        b2.astype(jnp.float32).reshape(1, OUT_FEATURES))
    return w1p, b1p, w2p, b2p


@functools.partial(jax.jit, static_argnames=("block_b",))
def mlp_forward(x, w1p, b1p, w2p, b2p, *, block_b=1024):
    """x: anything that flattens to (-1, 784).  Params from prepare_params().
    Returns f32 (B, 10)."""
    x2d = x.reshape(-1, IN_FEATURES)
    B = x2d.shape[0]
    H_pad = w1p.shape[1]
    N_pad = w2p.shape[1]

    # Batch tile: multiple of 16 (bf16 sublane packing), capped at block_b,
    # and capped at ceil(B/2) so the grid has >= 2 steps when B is large
    # (v7x megacore shards the "parallel" batch axis across its two TCs).
    TB = min(block_b, _round_up(pl.cdiv(B, 2), 16))
    grid = (pl.cdiv(B, TB),)  # ragged last block is masked by Pallas

    wbytes = jnp.dtype(w1p.dtype).itemsize
    flops = 2 * B * (IN_FEATURES * H_pad + H_pad * N_pad)
    bytes_accessed = (
        B * IN_FEATURES * x2d.dtype.itemsize   # x (read as-is, no pre-pad)
        + IN_FEATURES * H_pad * wbytes         # w1
        + H_pad * N_pad * wbytes               # w2
        + (H_pad + N_pad) * 4                  # biases (f32)
        + B * N_pad * 4                        # output (f32)
    )

    out_padded = pl.pallas_call(
        mlp_kernel,
        out_shape=jax.ShapeDtypeStruct((B, N_pad), jnp.float32),
        grid=grid,
        in_specs=[
            pl.BlockSpec((TB, IN_FEATURES), lambda i: (i, 0)),   # x tile, pipelined
            pl.BlockSpec((IN_FEATURES, H_pad), lambda i: (0, 0)),  # w1, resident
            pl.BlockSpec((1, H_pad), lambda i: (0, 0)),             # b1, resident
            pl.BlockSpec((H_pad, N_pad), lambda i: (0, 0)),         # w2, resident
            pl.BlockSpec((1, N_pad), lambda i: (0, 0)),             # b2, resident
        ],
        out_specs=pl.BlockSpec((TB, N_pad), lambda i: (i, 0)),
        compiler_params=pltpu.CompilerParams(
            dimension_semantics=("parallel",),
        ),
        cost_estimate=pl.CostEstimate(
            flops=flops, transcendentals=0, bytes_accessed=bytes_accessed
        ),
    )(x2d, w1p, b1p, w2p, b2p)

    # Downstream consumers that tolerate the padded (B, 128) layout can take
    # out_padded directly and skip this column slice.
    return out_padded[:, :OUT_FEATURES]


def init_params(key, hidden=100, dtype=jnp.float32):
    """Deterministic synthetic init (uniform, PyTorch-Linear-like scaling)."""
    k1, k2, k3, k4 = jax.random.split(key, 4)
    lim1 = 1.0 / jnp.sqrt(784.0)
    lim2 = 1.0 / jnp.sqrt(float(hidden))
    w1 = jax.random.uniform(k1, (784, hidden), dtype, -lim1, lim1)
    b1 = jax.random.uniform(k2, (1, hidden), dtype, -lim1, lim1)
    w2 = jax.random.uniform(k3, (hidden, 10), dtype, -lim2, lim2)
    b2 = jax.random.uniform(k4, (1, 10), dtype, -lim2, lim2)
    return w1, b1, w2, b2


if __name__ == "__main__":
    key = jax.random.PRNGKey(0)
    kx, kp = jax.random.split(key)

    # Small MNIST-like batch: (B, 1, 28, 28) -> flattened to (B, 784) inside.
    B, hidden = 8, 100
    x = jax.random.normal(kx, (B, 1, 28, 28), jnp.float32)
    w1, b1, w2, b2 = init_params(kp, hidden=hidden)

    # Pad/cast parameters once, outside the jitted per-call path.
    w1p, b1p, w2p, b2p = prepare_params(w1, b1, w2, b2)

    out = mlp_forward(x, w1p, b1p, w2p, b2p)
    out = jax.block_until_ready(out)
    assert out.shape == (B, 10)
    assert out.dtype == jnp.float32

    # Reference computed with the same bf16-in / f32-accumulate recipe.
    xb = x.reshape(-1, 784).astype(jnp.bfloat16)
    h = jnp.dot(xb, w1.astype(jnp.bfloat16),
                preferred_element_type=jnp.float32) + b1
    ref = jnp.dot(h.astype(jnp.bfloat16), w2.astype(jnp.bfloat16),
                  preferred_element_type=jnp.float32) + b2
    assert jnp.allclose(out, ref, atol=2e-2, rtol=2e-2), (
        float(jnp.max(jnp.abs(out - ref))))

    # Also loosely check against the pure-f32 math (bf16 rounding only).
    ref32 = x.reshape(-1, 784) @ w1 + b1
    ref32 = ref32 @ w2 + b2
    assert jnp.allclose(out, ref32, atol=5e-2, rtol=5e-2)

    print("KERNEL_OK")
</pallas_src>

<mosaic_0001>
module attributes {stable_mosaic.version = 11 : i64} {
  func.func @mlp_kernel(%arg0: i32, %arg1: memref<16x784xf32, #tpu.memory_space<vmem>>, %arg2: memref<784x128xbf16, #tpu.memory_space<vmem>>, %arg3: memref<1x128xf32, #tpu.memory_space<vmem>>, %arg4: memref<128x128xbf16, #tpu.memory_space<vmem>>, %arg5: memref<1x128xf32, #tpu.memory_space<vmem>>, %arg6: memref<16x128xf32, #tpu.memory_space<vmem>>) attributes {dimension_semantics = [#tpu.dimension_semantics<parallel>], iteration_bounds = array<i64: 1>, scalar_prefetch = 0 : i64, scratch_operands = 0 : i64, tpu.core_type = #tpu.core_type<tc>, window_params = [{transform_indices = @transform_0, window_bounds = array<i64: 16, 784>}, {pipeline_mode = #tpu.pipeline_mode<synchronous>, transform_indices = @transform_1, window_bounds = array<i64: 784, 128>}, {pipeline_mode = #tpu.pipeline_mode<synchronous>, transform_indices = @transform_2, window_bounds = array<i64: 1, 128>}, {pipeline_mode = #tpu.pipeline_mode<synchronous>, transform_indices = @transform_3, window_bounds = array<i64: 128, 128>}, {pipeline_mode = #tpu.pipeline_mode<synchronous>, transform_indices = @transform_4, window_bounds = array<i64: 1, 128>}, {transform_indices = @transform_5, window_bounds = array<i64: 16, 128>}]} {
    %c0 = arith.constant 0 : index
    %c0_0 = arith.constant 0 : index
    %0 = vector.load %arg1[%c0, %c0_0] : memref<16x784xf32, #tpu.memory_space<vmem>>, vector<16x784xf32>
    %1 = arith.truncf %0 : vector<16x784xf32> to vector<16x784xbf16>
    %c0_1 = arith.constant 0 : index
    %c0_2 = arith.constant 0 : index
    %2 = vector.load %arg2[%c0_1, %c0_2] : memref<784x128xbf16, #tpu.memory_space<vmem>>, vector<784x128xbf16>
    %cst = arith.constant dense<0.000000e+00> : vector<16x128xf32>
    %3 = tpu.matmul %1, %2, %cst {dimension_numbers = #tpu.dot_dimension_numbers<[1], [0], [0], [1], [0, 0, 1, 1], [], []>} : vector<16x784xbf16>, vector<784x128xbf16>, vector<16x128xf32> -> vector<16x128xf32>
    %c0_3 = arith.constant 0 : index
    %c0_4 = arith.constant 0 : index
    %4 = vector.load %arg3[%c0_3, %c0_4] : memref<1x128xf32, #tpu.memory_space<vmem>>, vector<1x128xf32>
    %5 = vector.broadcast %4 : vector<1x128xf32> to vector<16x128xf32>
    %6 = arith.addf %3, %5 : vector<16x128xf32>
    %7 = arith.truncf %6 : vector<16x128xf32> to vector<16x128xbf16>
    %c0_5 = arith.constant 0 : index
    %c0_6 = arith.constant 0 : index
    %8 = vector.load %arg4[%c0_5, %c0_6] : memref<128x128xbf16, #tpu.memory_space<vmem>>, vector<128x128xbf16>
    %cst_7 = arith.constant dense<0.000000e+00> : vector<16x128xf32>
    %9 = tpu.matmul %7, %8, %cst_7 {dimension_numbers = #tpu.dot_dimension_numbers<[1], [0], [0], [1], [0, 0, 1, 1], [], []>} : vector<16x128xbf16>, vector<128x128xbf16>, vector<16x128xf32> -> vector<16x128xf32>
    %c0_8 = arith.constant 0 : index
    %c0_9 = arith.constant 0 : index
    %10 = vector.load %arg5[%c0_8, %c0_9] : memref<1x128xf32, #tpu.memory_space<vmem>>, vector<1x128xf32>
    %11 = vector.broadcast %10 : vector<1x128xf32> to vector<16x128xf32>
    %12 = arith.addf %9, %11 : vector<16x128xf32>
    %c0_10 = arith.constant 0 : index
    %c0_11 = arith.constant 0 : index
    %13 = vector.load %arg6[%c0_10, %c0_11] : memref<16x128xf32, #tpu.memory_space<vmem>>, vector<16x128xf32>
    tpu.vector_store %arg6[%c0_10, %c0_11], %12 {strides = array<i32>} : memref<16x128xf32, #tpu.memory_space<vmem>>, vector<16x128xf32>,
    return
  }
  func.func @transform_0(%arg0: i32) -> (i32, i32) {
    %c0_i32 = arith.constant 0 : i32
    %c0_i32_0 = arith.constant 0 : i32
    return %arg0, %c0_i32 : i32, i32
  }
  func.func @transform_1(%arg0: i32) -> (i32, i32) {
    %c0_i32 = arith.constant 0 : i32
    %c0_i32_0 = arith.constant 0 : i32
    %c0_i32_1 = arith.constant 0 : i32
    return %c0_i32, %c0_i32_0 : i32, i32
  }
  func.func @transform_2(%arg0: i32) -> (i32, i32) {
    %c0_i32 = arith.constant 0 : i32
    %c0_i32_0 = arith.constant 0 : i32
    %c0_i32_1 = arith.constant 0 : i32
    return %c0_i32, %c0_i32_0 : i32, i32
  }
  func.func @transform_3(%arg0: i32) -> (i32, i32) {
    %c0_i32 = arith.constant 0 : i32
    %c0_i32_0 = arith.constant 0 : i32
    %c0_i32_1 = arith.constant 0 : i32
    return %c0_i32, %c0_i32_0 : i32, i32
  }
  func.func @transform_4(%arg0: i32) -> (i32, i32) {
    %c0_i32 = arith.constant 0 : i32
    %c0_i32_0 = arith.constant 0 : i32
    %c0_i32_1 = arith.constant 0 : i32
    return %c0_i32, %c0_i32_0 : i32, i32
  }
  func.func @transform_5(%arg0: i32) -> (i32, i32) {
    %c0_i32 = arith.constant 0 : i32
    %c0_i32_0 = arith.constant 0 : i32
    return %arg0, %c0_i32 : i32, i32
  }
}

</mosaic_0001>

<bundles_post_ra>
// kernel: mlp_forward.1
= control target key start
LH: loop header
LB: loop body
LE: loop exit
PB: predicated region body
PF: predicated region fallthrough
CT: control target
= control target key end

     0   :  { %10 = vsyncpa [#allocation3], 0  ;;  %v988_v41 = vmov 0.0   ;;  %vm989_vm0 = vmmov 0   ;;  %vm442_vm1 = vcmask 130048   ;;  %s1258_s0 = inlined_call_operand.vmem [shape: f32[8,784], index: 0, kind: input, shape index: {}]   ;;  %s1259_s1 = inlined_call_operand.vmem [shape: bf16[784,128], index: 1, kind: input, shape index: {}]   ;;  %s1260_s2 = inlined_call_operand.vmem [shape: f32[1,128], index: 2, kind: input, shape index: {}]   ;;  %s1261_s3 = inlined_call_operand.vmem [shape: bf16[128,128], index: 3, kind: input, shape index: {}]   ;;  %s1262_s4 = inlined_call_operand.vmem [shape: f32[1,128], index: 4, kind: input, shape index: {}]   ;;  %s1263_s5 = inlined_call_operand.hbm [shape: f32[8,128], index: 5, kind: output, shape index: {}]  }
   0x1   :  { %v909_v0 = vld [vmem:[%s1259_s1 + $0x78] sm:$0xff]   ;;  %v913_v4 = vld [vmem:[%s1259_s1 + $0x70] sm:$0xff]   ;;  %v917_v8 = vld [vmem:[%s1259_s1 + $0x68] sm:$0xff]  }
   0x2   :  { %v910_v1 = vld [vmem:[%s1259_s1 + $0x38] sm:$0xff]   ;;  %801 = vmatprep.subr.bf16.mxu0 %v909_v0  ;;  %v914_v5 = vld [vmem:[%s1259_s1 + $0x30] sm:$0xff]   ;;  %v918_v9 = vld [vmem:[%s1259_s1 + $0x28] sm:$0xff]  }
   0x3   :  { %v911_v2 = vld [vmem:[%s1259_s1 + $0xf8] sm:$0xff]   ;;  %802 = vmatpush3.bf16.msra.mxu0 %v910_v1  ;;  %v915_v6 = vld [vmem:[%s1259_s1 + $0xf0] sm:$0xff]   ;;  %v919_v10 = vld [vmem:[%s1259_s1 + $0xe8] sm:$0xff]  }
   0x4   :  { %v912_v3 = vld [vmem:[%s1259_s1 + $0xb8] sm:$0xff]   ;;  %823 = vmatprep.subr.bf16.mxu1 %v911_v2  ;;  %803 = vmatprep.subr.bf16.mxu0 %v913_v4  ;;  %v916_v7 = vld [vmem:[%s1259_s1 + $0xb0] sm:$0xff]   ;;  %v920_v11 = vld [vmem:[%s1259_s1 + $0xa8] sm:$0xff]  }
   0x5   :  { %824 = vmatpush3.bf16.msra.mxu1 %v912_v3  ;;  %v921_v12 = vld [vmem:[%s1259_s1 + $0x60] sm:$0xff]   ;;  %v925_v16 = vld [vmem:[%s1259_s1 + $0x58] sm:$0xff]   ;;  %v929_v20 = vld [vmem:[%s1259_s1 + $0x50] sm:$0xff]  }
   0x6   :  { %825 = vmatprep.subr.bf16.mxu1 %v915_v6  ;;  %v922_v13 = vld [vmem:[%s1259_s1 + $0x20] sm:$0xff]   ;;  %v926_v17 = vld [vmem:[%s1259_s1 + $0x18] sm:$0xff]   ;;  %v930_v21 = vld [vmem:[%s1259_s1 + $0x10] sm:$0xff]  }
   0x7   :  { %804 = vmatpush3.bf16.msra.mxu0 %v914_v5  ;;  %v923_v14 = vld [vmem:[%s1259_s1 + $0xe0] sm:$0xff]   ;;  %v927_v18 = vld [vmem:[%s1259_s1 + $0xd8] sm:$0xff]   ;;  %v931_v22 = vld [vmem:[%s1259_s1 + $0xd0] sm:$0xff]  }
   0x8   :  { %805 = vmatprep.subr.bf16.mxu0 %v917_v8  ;;  %v924_v15 = vld [vmem:[%s1259_s1 + $0xa0] sm:$0xff]   ;;  %v928_v19 = vld [vmem:[%s1259_s1 + $0x98] sm:$0xff]   ;;  %v932_v23 = vld [vmem:[%s1259_s1 + $0x90] sm:$0xff]  }
   0x9   :  { %826 = vmatpush3.bf16.msra.mxu1 %v916_v7  ;;  %v933_v24 = vld [vmem:[%s1259_s1 + $0x48] sm:$0xff]   ;;  %v937_v28 = vld [vmem:[%s1259_s1 + $0x40] sm:$0xff]   ;;  %v29_v36 = vld [vmem:[%s1258_s0 + $0x38] sm:$0xff] }
   0xa   :  { %827 = vmatprep.subr.bf16.mxu1 %v919_v10  ;;  %v934_v25 = vld [vmem:[%s1259_s1 + $0x8] sm:$0xff]   ;;  %v938_v29 = vld [vmem:[%s1259_s1] sm:$0xff]   ;;  %v941_v38 = vld [vmem:[%s1259_s1 + $0x178] sm:$0xff]  }
   0xb   :  { %806 = vmatpush3.bf16.msra.mxu0 %v918_v9  ;;  %v935_v26 = vld [vmem:[%s1259_s1 + $0xc8] sm:$0xff]   ;;  %v939_v30 = vld [vmem:[%s1259_s1 + $0xc0] sm:$0xff]   ;;  %v25_v39 = vld [vmem:[%s1258_s0 + $0x18] sm:$0xff] }
   0xc   :  { %807 = vmatprep.subr.bf16.mxu0 %v921_v12  ;;  %v936_v27 = vld [vmem:[%s1259_s1 + $0x88] sm:$0xff]   ;;  %v30_v32 = vld [vmem:[%s1258_s0 + $0x40] sm:$0xff]  ;;  %v32_v40 = vld [vmem:[%s1258_s0 + $0x50] sm:$0xff] }
   0xd   :  { %828 = vmatpush3.bf16.msra.mxu1 %v920_v11  ;;  %v23_v31 = vld [vmem:[%s1258_s0 + $0x8] sm:$0xff]  ;;  %v940_v34 = vld [vmem:[%s1259_s1 + $0x80] sm:$0xff]   ;;  %v39_v42 = vpack.c.bf16 %v32_v40, %v25_v39  ;;  %v942_v43 = vld [vmem:[%s1259_s1 + $0x138] sm:$0xff]  }
   0xe   :  { %829 = vmatprep.subr.bf16.mxu1 %v923_v14  ;;  %v37_v33 = vpack.c.bf16 %v30_v32, %v23_v31  ;;  %v22_v35 = vld [vmem:[%s1258_s0] sm:$0xff]  ;;  %v24_v44 = vld [vmem:[%s1258_s0 + $0x10] sm:$0xff]  ;;  %v31_v45 = vld [vmem:[%s1258_s0 + $0x48] sm:$0xff] }
   0xf   :  { %808 = vmatpush3.bf16.msra.mxu0 %v922_v13  ;;  %v36_v37 = vpack.c.bf16 %v29_v36, %v22_v35  ;;  %v38_v46 = vpack.c.bf16 %v31_v45, %v24_v44  ;;  %v943_v47 = vld [vmem:[%s1259_s1 + $0x170] sm:$0xff]   ;;  %519 = vmatprep.mubr.bf16.mxu1 %v39_v42  ;;  %v945_v49 = vld [vmem:[%s1259_s1 + $0x168] sm:$0xff]   ;;  %v947_v51 = vld [vmem:[%s1259_s1 + $0x160] sm:$0xff]  }
  0x10   :  { %809 = vmatprep.subr.bf16.mxu0 %v925_v16  ;;  %478 = vmatprep.mubr.bf16.mxu0 %v37_v33  ;;  %v944_v48 = vld [vmem:[%s1259_s1 + $0x130] sm:$0xff]   ;;  %v946_v50 = vld [vmem:[%s1259_s1 + $0x128] sm:$0xff]   ;;  %v948_v52 = vld [vmem:[%s1259_s1 + $0x120] sm:$0xff]  }
  0x11   :  { %830 = vmatpush3.bf16.msra.mxu1 %v924_v15  ;;  %v949_v53 = vld [vmem:[%s1259_s1 + $0x158] sm:$0xff]   ;;  %v951_v55 = vld [vmem:[%s1259_s1 + $0x150] sm:$0xff]   ;;  %v957_v56 = vld [vmem:[%s1259_s1 + $0x180] sm:$0xff]  }
  0x12   :  { %831 = vmatprep.subr.bf16.mxu1 %v927_v18  ;;  %v950_v54 = vld [vmem:[%s1259_s1 + $0x118] sm:$0xff]   ;;  %v952_v57 = vld [vmem:[%s1259_s1 + $0x110] sm:$0xff]   ;;  %v27_v58 = vld [vmem:[%s1258_s0 + $0x28] sm:$0xff] }
  0x13   :  { %810 = vmatpush3.bf16.msra.mxu0 %v926_v17  ;;  %v34_v59 = vld [vmem:[%s1258_s0 + $0x60] sm:$0xff]  ;;  %v953_v60 = vld [vmem:[%s1259_s1 + $0x148] sm:$0xff]   ;;  %v28_v62 = vld [vmem:[%s1258_s0 + $0x30] sm:$0xff] }
  0x14   :  { %811 = vmatprep.subr.bf16.mxu0 %v929_v20  ;;  %v41_v61 = vpack.c.bf16 %v34_v59, %v27_v58  ;;  %v35_v63 = vld [vmem:[%s1258_s0 + $0x68] sm:$0xff]  ;;  %v955_v2 = vld [vmem:[%s1259_s1 + $0x140] sm:$0xff]   ;;  %v33_v5 = vld [vmem:[%s1258_s0 + $0x58] sm:$0xff] }
  0x15   :  { %832 = vmatpush3.bf16.msra.mxu1 %v928_v19  ;;  %v42_v0 = vpack.c.bf16 %v35_v63, %v28_v62  ;;  %v954_v1 = vld [vmem:[%s1259_s1 + $0x108] sm:$0xff]   ;;  %v956_v3 = vld [vmem:[%s1259_s1 + $0x100] sm:$0xff]   ;;  %v958_v7 = vld [vmem:[%s1261_s3 + $0x38] sm:$0xff]  }
  0x16   :  { %833 = vmatprep.subr.bf16.mxu1 %v931_v22  ;;  %v26_v4 = vld [vmem:[%s1258_s0 + $0x20] sm:$0xff]  ;;  %v959_v8 = vld [vmem:[%s1261_s3 + $0x30] sm:$0xff]   ;;  %v960_v9 = vld [vmem:[%s1261_s3 + $0x28] sm:$0xff]  }
  0x17   :  { %812 = vmatpush3.bf16.msra.mxu0 %v930_v21  ;;  %v40_v6 = vpack.c.bf16 %v33_v5, %v26_v4  ;;  %v961_v10 = vld [vmem:[%s1261_s3 + $0x20] sm:$0xff]   ;;  %v962_v11 = vld [vmem:[%s1261_s3 + $0x18] sm:$0xff]   ;;  %v963_v12 = vld [vmem:[%s1261_s3 + $0x10] sm:$0xff]  }
  0x18   :  { %813 = vmatprep.subr.bf16.mxu0 %v933_v24  ;;  %v964_v13 = vld [vmem:[%s1261_s3 + $0x8] sm:$0xff]   ;;  %v965_v14 = vld [vmem:[%s1261_s3] sm:$0xff]  }
  0x19   :  { %834 = vmatpush3.bf16.msra.mxu1 %v932_v23 }
  0x1a   :  { %835 = vmatprep.subr.bf16.mxu1 %v935_v26 }
  0x1b   :  { %814 = vmatpush3.bf16.msra.mxu0 %v934_v25 }
  0x1c   :  { %815 = vmatprep.subr.bf16.mxu0 %v937_v28  ;;  %v741_v28 = vld [vmem:[%s1260_s2] ss:$0 sm:$0xff] }
  0x1d   :  { %836 = vmatpush3.bf16.msra.mxu1 %v936_v27 }
  0x1e   :  { %837 = vmatprep.subr.bf16.mxu1 %v939_v30 }
  0x1f   :  { %816 = vmatpush3.bf16.msra.mxu0 %v938_v29 }
  0x20   :  { %845 = vmatprep.subr.bf16.mxu0 %v941_v38 }
  0x21   :  { %838 = vmatpush3.bf16.msra.mxu1 %v940_v34 }
  0x22   :  { %878 = vmatprep.subr.bf16.mxu1 %v988_v41  ;;  %479 = vmatmul.mubr.bf16.vlgmr.msra.gmra.mxu0 %v36_v37 }
  0x23   :  { %846 = vmatpush3.bf16.msra.mxu0 %v942_v43  ;;  %560 = vmatprep.mubr.bf16.mxu0 %v41_v61 }
  0x24   :  { %520 = vmatmul.mubr.bf16.vlgmr.msra.gmra.mxu1 %v38_v46  ;;  %847 = vmatprep.subr.bf16.mxu0 %v943_v47  ;;  %v792_v47 = vld [vmem:[%s1262_s4] ss:$0 sm:$0xff] }
  0x25   :  { %880 = vmatprep.mubr.msk.bf16.mxu1 %vm989_vm0, %v988_v41  ;;  %879 = vmatpush3.bf16.msra.mxu1 %v957_v56 }
  0x26   :  { %884 = vmatprep.subr.bf16.mxu1 %v988_v41 }
  0x27   :  { %848 = vmatpush3.bf16.msra.mxu0 %v944_v48 }
  0x28   :  { %849 = vmatprep.subr.bf16.mxu0 %v945_v49 }
  0x2b   :  { %850 = vmatpush3.bf16.msra.mxu0 %v946_v50 }
  0x2c   :  { %851 = vmatprep.subr.bf16.mxu0 %v947_v51  ;;  %881 = vmatmul.mubr.msk.bf16.vlgmr.msra.gmra.mxu1 %vm442_vm1, %v42_v0 }
  0x2d   :  { %900 = vmatprep.mubr.msk.bf16.mxu1 %vm989_vm0, %v988_v41  ;;  %885 = vmatpush3.bf16.msra.mxu1 %v958_v7 }
  0x2e   :  { %886 = vmatprep.subr.bf16.mxu1 %v988_v41 }
  0x2f   :  { %852 = vmatpush3.bf16.msra.mxu0 %v948_v52 }
  0x30   :  { %853 = vmatprep.subr.bf16.mxu0 %v949_v53 }
  0x31   :  { %887 = vmatpush3.bf16.msra.mxu1 %v959_v8 }
  0x32   :  { %888 = vmatprep.subr.bf16.mxu1 %v988_v41 }
  0x33   :  { %854 = vmatpush3.bf16.msra.mxu0 %v950_v54 }
  0x34   :  { %855 = vmatprep.subr.bf16.mxu0 %v951_v55 }
  0x35   :  { %889 = vmatpush3.bf16.msra.mxu1 %v960_v9 }
  0x36   :  { %890 = vmatprep.subr.bf16.mxu1 %v988_v41 }
  0x37   :  { %856 = vmatpush3.bf16.msra.mxu0 %v952_v57 }
  0x38   :  { %857 = vmatprep.subr.bf16.mxu0 %v953_v60 }
  0x39   :  { %891 = vmatpush3.bf16.msra.mxu1 %v961_v10 }
  0x3a   :  { %892 = vmatprep.subr.bf16.mxu1 %v988_v41 }
  0x3b   :  { %858 = vmatpush3.bf16.msra.mxu0 %v954_v1 }
  0x3c   :  { %859 = vmatprep.subr.bf16.mxu0 %v955_v2 }
  0x3d   :  { %893 = vmatpush3.bf16.msra.mxu1 %v962_v11 }
  0x3e   :  { %894 = vmatprep.subr.bf16.mxu1 %v988_v41 }
  0x3f   :  { %860 = vmatpush3.bf16.msra.mxu0 %v956_v3 }
  0x41   :  { %895 = vmatpush3.bf16.msra.mxu1 %v963_v12 }
  0x42   :  { %561 = vmatmul.mubr.bf16.vlgmr.msra.gmra.mxu0 %v40_v6  ;;  %896 = vmatprep.subr.bf16.mxu1 %v988_v41 }
  0x45   :  { %897 = vmatpush3.bf16.msra.mxu1 %v964_v13 }
  0x46   :  { %898 = vmatprep.subr.bf16.mxu1 %v988_v41 }
  0x49   :  { %899 = vmatpush3.bf16.msra.mxu1 %v965_v14 }
  0xe2   :  { %v817_v18 = vpop.f32.mrf.mxu0 }
  0xe4   :  { %v839_v15 = vpop.f32.mrf.mxu1  ;;  %v818_v21 = vpop.f32.mrf.mxu0 }
  0xe5   :  { %v819_v27 = vadd.f32 %v818_v21, %v817_v18 }
  0xe6   :  { %v840_v16 = vpop.f32.mrf.mxu1  ;;  %v820_v24 = vpop.f32.mrf.mxu0 }
  0xe7   :  { %v481_v31 = vadd.f32 %v819_v27, %v741_v28  ;;  %v841_v32 = vadd.f32 %v840_v16, %v839_v15 }
  0xe8   :  { %v842_v17 = vpop.f32.mrf.mxu1  ;;  %v821_v26 = vpop.f32.mrf.mxu0 }
  0xe9   :  { %v822_v29 = vadd.f32 %v821_v26, %v820_v24  ;;  %v522_v38 = vadd.f32 %v841_v32, %v481_v31 }
  0xea   :  { %v843_v19 = vpop.f32.mrf.mxu1 }
  0xeb   :  { %v484_v34 = vadd.f32 %v822_v29, %v741_v28  ;;  %v844_v35 = vadd.f32 %v843_v19, %v842_v17 }
  0xec   :  { %v603_v20 = vpop.f32.mrf.mxu1 }
  0xed   :  { %v525_v40 = vadd.f32 %v844_v35, %v484_v34 }
  0xee   :  { %v882_v22 = vpop.f32.mrf.mxu1 }
  0xf0   :  { %v606_v23 = vpop.f32.mrf.mxu1 }
  0xf2   :  { %v883_v25 = vpop.f32.mrf.mxu1 }
 0x102   :  { %v861_v30 = vpop.f32.mrf.mxu0 }
 0x104   :  { %v862_v33 = vpop.f32.mrf.mxu0 }
 0x105   :  { %v863_v36 = vadd.f32 %v862_v33, %v861_v30 }
 0x106   :  { %v864_v37 = vpop.f32.mrf.mxu0 }
 0x107   :  { %v563_v41 = vadd.f32 %v863_v36, %v522_v38 }
 0x108   :  { %v865_v39 = vpop.f32.mrf.mxu0 }
 0x109   :  { %v866_v42 = vadd.f32 %v865_v39, %v864_v37  ;;  %v604_v44 = vadd.f32 %v603_v20, %v563_v41 }
 0x10b   :  { %v566_v43 = vadd.f32 %v866_v42, %v525_v40 }
 0x10d   :  { %v607_v45 = vadd.f32 %v606_v23, %v566_v43 }
 0x10f   :  { %v610_v46 = vpack.c.bf16 %v607_v45, %v604_v44 }
 0x111   :  { %901 = vmatmul.mubr.bf16.vlgmr.msra.gmra.mxu1 %v610_v46 }
 0x1d1   :  { %v716_v48 = vpop.f32.mrf.mxu1 }
 0x1d2   :  { %v717_v49 = vadd.f32 %v792_v47, %v716_v48 }
 0x1d3   :  { %v902_v50 = vpop.f32.mrf.mxu1 }
 0x1d4   :  { %723 = vst [vmem:[#allocation2] sm:$0xff] %v717_v49 }
 0x1d5   :  { %v719_v51 = vpop.f32.mrf.mxu1 }
 0x1d6   :  { %v720_v52 = vadd.f32 %v792_v47, %v719_v51 }
 0x1d7   :  { %v903_v53 = vpop.f32.mrf.mxu1 }
 0x1d8   :  { %724 = vst [vmem:[#allocation2 + $0x8] sm:$0xff] %v720_v52 }
 0x1d9   :  { %729 = vsyncadd [#allocation3], 128  ;;  %s990_s10 = smov [#allocation2]  }
 0x1da   :  { %s730_s11 = sshll.u32 %s990_s10, 4  ;;  %s731_s11 = int_to_ptr.vmem [resolvable:$true] %s730_s11 }
 0x1db   :  { %s966_s12 = scalar_lea.vmem %s731_s11, 128  ;;  %s970_s13 = scalar_lea.vmem %s731_s11, 256 }
 0x1dc   :  { %p967_p0 = scmp.ne.s32.totalorder %s731_s11, %s966_s12  ;;  %p971_p1 = scmp.lt.s32.totalorder %s731_s11, %s731_s11 }
 0x1dd   :  { %p972_p2 = scmp.lt.s32.totalorder %s970_s13, %s966_s12 }
 0x1df   :  { %p973_p3 = por %p972_p2, %p971_p1 }
 0x1e1   :  { %p974_p4 = pnand %p973_p3, %p967_p0 }
 0x1e3   :  { %977 = shalt.err (!%p974_p4)
}
 0x1e4   :  { %s991_s4 = smov 128   ;;  %s992_s14 = smov 8  }
 0x1e5   :  { %736 = dma.vmem_to_hbm [thread:$0]  %s731_s11, 128, %s1263_s5, [#allocation3], %s991_s4, %s991_s4, %s992_s14  }
 0x1e6   :  { %986 = dma.done.wait [#allocation3], 256  }
 0x1e7   :  { %987 = vsyncadd [#allocation3], 4294967040 }
 0x1e8   :  { %740 = vsyncpa [#allocation3], 1 }

</bundles_post_ra>
